<compile_context>
chip_gen: v7x
topology: tpu7x:2x2x1
jax: 0.10.0
libtpu: 0.0.40
codegen_flags: <defaults>
</compile_context>

<pallas_src>
import jax
import jax.numpy as jnp
from jax.experimental import pallas as pl
from jax.experimental.pallas import tpu as pltpu


# ----------------------------------------------------------------------------
# Fused Pallas kernel: 4x (conv+BN+ReLU+pool) + mean + Linear, per batch row.
# ----------------------------------------------------------------------------
def audio_cnn_pool_kernel(x_ref,
                          w0_ref, b0_ref,
                          w1_ref, b1_ref,
                          w2_ref, b2_ref,
                          w3_ref, b3_ref,
                          fcw_ref, fcb_ref,
                          o_ref):
    """One grid step = one batch element (batch dim squeezed by the BlockSpec).

    x_ref:   (L, 10)              bf16 channels-last input row
    wK_ref:  (3, Cin_k, Cout_k)   bf16 conv taps, BN scale folded in
    bK_ref:  (1, Cout_k)          f32  conv bias with BN folded in
    fcw_ref: (128, num_classes)   bf16 FC weight with 1/L_final folded in
    fcb_ref: (1, num_classes)     f32
    o_ref:   (1, num_classes)     f32
    """

    def conv_block(x, w_ref, b_ref):
        Lc = x.shape[0] - 2                       # conv out length (k=3, s=1, p=0)
        xb = x.astype(jnp.bfloat16)               # down-cast just before the MXU
        # 3 lane-aligned dots (K = Cin) accumulated in f32 on the MXU.
        acc = jnp.dot(xb[0:Lc, :], w_ref[0], preferred_element_type=jnp.float32)
        acc = acc + jnp.dot(xb[1:Lc + 1, :], w_ref[1],
                            preferred_element_type=jnp.float32)
        acc = acc + jnp.dot(xb[2:Lc + 2, :], w_ref[2],
                            preferred_element_type=jnp.float32)
        y = jnp.maximum(acc + b_ref[...], 0.0)    # folded-BN bias + ReLU, f32 VPU
        # MaxPool1d(kernel=2, stride=1): out length Lc - 1, f32.
        return jnp.maximum(y[:Lc - 1, :], y[1:, :])

    x = x_ref[...]                                # (L, 10) bf16
    x = conv_block(x, w0_ref, b0_ref)
    x = conv_block(x, w1_ref, b1_ref)
    x = conv_block(x, w2_ref, b2_ref)
    x = conv_block(x, w3_ref, b3_ref)             # (L_final, 128) f32

    # mean over time: 1/L_final is pre-folded into fcw, so just sum-reduce (XLU).
    m = jnp.sum(x, axis=0, keepdims=True)         # (1, 128) f32
    out = jnp.dot(m.astype(jnp.bfloat16), fcw_ref[...],
                  preferred_element_type=jnp.float32) + fcb_ref[...]
    o_ref[...] = out.astype(o_ref.dtype)


# ----------------------------------------------------------------------------
# Wrapper: fold BN + 1/L, cast to bf16, one pallas_call with a batch grid.
# ----------------------------------------------------------------------------
def audio_cnn_pool_forward(x_ncw, params):
    """x_ncw: (B, C=10, L) PyTorch NCW layout. Returns (B, num_classes) f32."""
    x = jnp.transpose(x_ncw, (0, 2, 1)).astype(jnp.bfloat16)   # (B, L, C) bf16
    B, L, cin0 = x.shape

    kernel_args = []
    in_specs = [pl.BlockSpec((None, L, cin0), lambda b: (b, 0, 0))]   # x, per-batch

    l_cur = L
    for p in params["blocks"]:
        # Fold eval-mode BatchNorm into the conv: (conv+b)*scale+shift
        #   == conv @ (w*scale) + (b*scale + shift)
        w = (p["w"] * p["scale"][None, None, :]).astype(jnp.bfloat16)  # (3,Cin,Cout)
        bias = (p["b"] * p["scale"] + p["shift"]).reshape(1, -1).astype(jnp.float32)
        kernel_args += [w, bias]
        # Constant index_maps -> weights stay resident, no re-DMA per grid step.
        in_specs += [pl.BlockSpec(tuple(w.shape), lambda b: (0, 0, 0)),
                     pl.BlockSpec(tuple(bias.shape), lambda b: (0, 0))]
        l_cur -= 3                                  # -2 (conv) -1 (pool, stride 1)
    assert l_cur > 0, "input too short for 4 conv blocks"

    fc_w = (params["fc_w"] / jnp.float32(l_cur)).astype(jnp.bfloat16)  # fold mean
    fc_b = params["fc_b"].reshape(1, -1).astype(jnp.float32)
    num_classes = fc_w.shape[1]
    kernel_args += [fc_w, fc_b]
    in_specs += [pl.BlockSpec(tuple(fc_w.shape), lambda b: (0, 0)),
                 pl.BlockSpec(tuple(fc_b.shape), lambda b: (0, 0))]

    # Output kept 3-D (B, 1, nc) so the last two block dims equal the full array
    # dims (1, nc); squeezed back to (B, nc) below.
    out3 = pl.pallas_call(
        audio_cnn_pool_kernel,
        out_shape=jax.ShapeDtypeStruct((B, 1, num_classes), jnp.float32),
        grid_spec=pltpu.PrefetchScalarGridSpec(
            num_scalar_prefetch=0,
            grid=(B,),
            in_specs=in_specs,
            out_specs=pl.BlockSpec((None, 1, num_classes), lambda b: (b, 0, 0)),
        ),
        compiler_params=pltpu.CompilerParams(
            dimension_semantics=("parallel",),        # shard batch across TCs (v7x)
            vmem_limit_bytes=32 * 1024 * 1024,        # explicit budget (v7x: 64 MiB phys)
        ),
    )(x, *kernel_args)
    return out3[:, 0, :]


# ----------------------------------------------------------------------------
# Deterministic parameter construction (synthetic; matches module shapes)
# ----------------------------------------------------------------------------
def make_params(key, num_classes=8):
    chans = [10, 64, 128, 256, 128]
    blocks = []
    eps = 1e-5
    for i in range(4):
        cin, cout = chans[i], chans[i + 1]
        key, k1, k2, k3, k4, k5, k6 = jax.random.split(key, 7)
        w = jax.random.normal(k1, (3, cin, cout), jnp.float32) * 0.1
        b = jax.random.normal(k2, (cout,), jnp.float32) * 0.1
        gamma = 1.0 + 0.1 * jax.random.normal(k3, (cout,), jnp.float32)
        beta = 0.1 * jax.random.normal(k4, (cout,), jnp.float32)
        r_mean = 0.1 * jax.random.normal(k5, (cout,), jnp.float32)
        r_var = jax.random.uniform(k6, (cout,), jnp.float32, 0.5, 1.5)
        scale = gamma / jnp.sqrt(r_var + eps)
        shift = beta - r_mean * scale
        blocks.append(dict(w=w, b=b, scale=scale, shift=shift))
    key, k1, k2 = jax.random.split(key, 3)
    fc_w = jax.random.normal(k1, (128, num_classes), jnp.float32) * 0.1
    fc_b = jax.random.normal(k2, (num_classes,), jnp.float32) * 0.1
    return dict(blocks=blocks, fc_w=fc_w, fc_b=fc_b)


# ----------------------------------------------------------------------------
# Pure-JAX f32 reference (unfused BN, HIGHEST precision) for correctness check
# ----------------------------------------------------------------------------
def ref_forward(x_ncw, params):
    hp = jax.lax.Precision.HIGHEST
    x = jnp.transpose(x_ncw, (0, 2, 1))
    for p in params["blocks"]:
        B, L, Cin = x.shape
        Lc = L - 2
        acc = jnp.zeros((B, Lc, p["w"].shape[2]), jnp.float32)
        for k in range(3):
            acc = acc + jnp.einsum("blc,cd->bld", x[:, k:k + Lc, :], p["w"][k],
                                   precision=hp)
        y = (acc + p["b"]) * p["scale"] + p["shift"]
        y = jnp.maximum(y, 0.0)
        x = jnp.maximum(y[:, :-1, :], y[:, 1:, :])
    m = jnp.mean(x, axis=1)
    return jnp.dot(m, params["fc_w"], precision=hp) + params["fc_b"]


if __name__ == "__main__":
    key = jax.random.PRNGKey(0)
    kx, kp = jax.random.split(key)

    B, C, T = 2, 10, 20  # NCW input; T=20 -> time length 8 after the 4 blocks
    x = jax.random.normal(kx, (B, C, T), jnp.float32)
    params = make_params(kp, num_classes=8)

    fwd = jax.jit(audio_cnn_pool_forward)
    out = jax.block_until_ready(fwd(x, params))

    ref = ref_forward(x, params)
    assert out.shape == (B, 8), out.shape
    # bf16 MXU operands vs f32 HIGHEST reference -> loose tolerance.
    assert jnp.allclose(out, ref, atol=5e-2, rtol=5e-2), (out, ref)

    print("KERNEL_OK")
</pallas_src>

<mosaic_0001>
module attributes {stable_mosaic.version = 11 : i64} {
  func.func @audio_cnn_pool_kernel(%arg0: i32, %arg1: memref<1x20x10xbf16, #tpu.memory_space<vmem>>, %arg2: memref<3x10x64xbf16, #tpu.memory_space<vmem>>, %arg3: memref<1x64xf32, #tpu.memory_space<vmem>>, %arg4: memref<3x64x128xbf16, #tpu.memory_space<vmem>>, %arg5: memref<1x128xf32, #tpu.memory_space<vmem>>, %arg6: memref<3x128x256xbf16, #tpu.memory_space<vmem>>, %arg7: memref<1x256xf32, #tpu.memory_space<vmem>>, %arg8: memref<3x256x128xbf16, #tpu.memory_space<vmem>>, %arg9: memref<1x128xf32, #tpu.memory_space<vmem>>, %arg10: memref<128x8xbf16, #tpu.memory_space<vmem>>, %arg11: memref<1x8xf32, #tpu.memory_space<vmem>>, %arg12: memref<1x1x8xf32, #tpu.memory_space<vmem>>) attributes {dimension_semantics = [#tpu.dimension_semantics<parallel>], iteration_bounds = array<i64: 2>, scalar_prefetch = 0 : i64, scratch_operands = 0 : i64, tpu.core_type = #tpu.core_type<tc>, window_params = [{transform_indices = @transform_0, window_bounds = array<i64: 1, 20, 10>}, {pipeline_mode = #tpu.pipeline_mode<synchronous>, transform_indices = @transform_1, window_bounds = array<i64: 3, 10, 64>}, {pipeline_mode = #tpu.pipeline_mode<synchronous>, transform_indices = @transform_2, window_bounds = array<i64: 1, 64>}, {pipeline_mode = #tpu.pipeline_mode<synchronous>, transform_indices = @transform_3, window_bounds = array<i64: 3, 64, 128>}, {pipeline_mode = #tpu.pipeline_mode<synchronous>, transform_indices = @transform_4, window_bounds = array<i64: 1, 128>}, {pipeline_mode = #tpu.pipeline_mode<synchronous>, transform_indices = @transform_5, window_bounds = array<i64: 3, 128, 256>}, {pipeline_mode = #tpu.pipeline_mode<synchronous>, transform_indices = @transform_6, window_bounds = array<i64: 1, 256>}, {pipeline_mode = #tpu.pipeline_mode<synchronous>, transform_indices = @transform_7, window_bounds = array<i64: 3, 256, 128>}, {pipeline_mode = #tpu.pipeline_mode<synchronous>, transform_indices = @transform_8, window_bounds = array<i64: 1, 128>}, {pipeline_mode = #tpu.pipeline_mode<synchronous>, transform_indices = @transform_9, window_bounds = array<i64: 128, 8>}, {pipeline_mode = #tpu.pipeline_mode<synchronous>, transform_indices = @transform_10, window_bounds = array<i64: 1, 8>}, {transform_indices = @transform_11, window_bounds = array<i64: 1, 1, 8>}]} {
    %c0 = arith.constant 0 : index
    %c0_0 = arith.constant 0 : index
    %c0_1 = arith.constant 0 : index
    %0 = vector.load %arg1[%c0, %c0_0, %c0_1] : memref<1x20x10xbf16, #tpu.memory_space<vmem>>, vector<1x20x10xbf16>
    %1 = vector.shape_cast %0 : vector<1x20x10xbf16> to vector<20x10xbf16>
    %2 = vector.extract_strided_slice %1 {offsets = [0, 0], sizes = [18, 10], strides = [1, 1]} : vector<20x10xbf16> to vector<18x10xbf16>
    %c0_2 = arith.constant 0 : index
    %c0_3 = arith.constant 0 : index
    %c0_4 = arith.constant 0 : index
    %3 = vector.load %arg2[%c0_2, %c0_3, %c0_4] : memref<3x10x64xbf16, #tpu.memory_space<vmem>>, vector<1x10x64xbf16>
    %4 = vector.shape_cast %3 : vector<1x10x64xbf16> to vector<10x64xbf16>
    %cst = arith.constant dense<0.000000e+00> : vector<18x64xf32>
    %5 = tpu.matmul %2, %4, %cst {dimension_numbers = #tpu.dot_dimension_numbers<[1], [0], [0], [1], [0, 0, 1, 1], [], []>} : vector<18x10xbf16>, vector<10x64xbf16>, vector<18x64xf32> -> vector<18x64xf32>
    %6 = vector.extract_strided_slice %1 {offsets = [1, 0], sizes = [18, 10], strides = [1, 1]} : vector<20x10xbf16> to vector<18x10xbf16>
    %c1 = arith.constant 1 : index
    %c0_5 = arith.constant 0 : index
    %c0_6 = arith.constant 0 : index
    %7 = vector.load %arg2[%c1, %c0_5, %c0_6] : memref<3x10x64xbf16, #tpu.memory_space<vmem>>, vector<1x10x64xbf16>
    %8 = vector.shape_cast %7 : vector<1x10x64xbf16> to vector<10x64xbf16>
    %cst_7 = arith.constant dense<0.000000e+00> : vector<18x64xf32>
    %9 = tpu.matmul %6, %8, %cst_7 {dimension_numbers = #tpu.dot_dimension_numbers<[1], [0], [0], [1], [0, 0, 1, 1], [], []>} : vector<18x10xbf16>, vector<10x64xbf16>, vector<18x64xf32> -> vector<18x64xf32>
    %10 = arith.addf %5, %9 : vector<18x64xf32>
    %11 = vector.extract_strided_slice %1 {offsets = [2, 0], sizes = [18, 10], strides = [1, 1]} : vector<20x10xbf16> to vector<18x10xbf16>
    %c2 = arith.constant 2 : index
    %c0_8 = arith.constant 0 : index
    %c0_9 = arith.constant 0 : index
    %12 = vector.load %arg2[%c2, %c0_8, %c0_9] : memref<3x10x64xbf16, #tpu.memory_space<vmem>>, vector<1x10x64xbf16>
    %13 = vector.shape_cast %12 : vector<1x10x64xbf16> to vector<10x64xbf16>
    %cst_10 = arith.constant dense<0.000000e+00> : vector<18x64xf32>
    %14 = tpu.matmul %11, %13, %cst_10 {dimension_numbers = #tpu.dot_dimension_numbers<[1], [0], [0], [1], [0, 0, 1, 1], [], []>} : vector<18x10xbf16>, vector<10x64xbf16>, vector<18x64xf32> -> vector<18x64xf32>
    %15 = arith.addf %10, %14 : vector<18x64xf32>
    %c0_11 = arith.constant 0 : index
    %c0_12 = arith.constant 0 : index
    %16 = vector.load %arg3[%c0_11, %c0_12] : memref<1x64xf32, #tpu.memory_space<vmem>>, vector<1x64xf32>
    %17 = vector.broadcast %16 : vector<1x64xf32> to vector<18x64xf32>
    %18 = arith.addf %15, %17 : vector<18x64xf32>
    %cst_13 = arith.constant 0.000000e+00 : f32
    %19 = vector.broadcast %cst_13 : f32 to vector<18x64xf32>
    %20 = arith.maximumf %18, %19 : vector<18x64xf32>
    %21 = vector.extract_strided_slice %20 {offsets = [0, 0], sizes = [17, 64], strides = [1, 1]} : vector<18x64xf32> to vector<17x64xf32>
    %22 = vector.extract_strided_slice %20 {offsets = [1, 0], sizes = [17, 64], strides = [1, 1]} : vector<18x64xf32> to vector<17x64xf32>
    %23 = arith.maximumf %21, %22 : vector<17x64xf32>
    %24 = arith.truncf %23 : vector<17x64xf32> to vector<17x64xbf16>
    %25 = vector.extract_strided_slice %24 {offsets = [0, 0], sizes = [15, 64], strides = [1, 1]} : vector<17x64xbf16> to vector<15x64xbf16>
    %c0_14 = arith.constant 0 : index
    %c0_15 = arith.constant 0 : index
    %c0_16 = arith.constant 0 : index
    %26 = vector.load %arg4[%c0_14, %c0_15, %c0_16] : memref<3x64x128xbf16, #tpu.memory_space<vmem>>, vector<1x64x128xbf16>
    %27 = vector.shape_cast %26 : vector<1x64x128xbf16> to vector<64x128xbf16>
    %cst_17 = arith.constant dense<0.000000e+00> : vector<15x128xf32>
    %28 = tpu.matmul %25, %27, %cst_17 {dimension_numbers = #tpu.dot_dimension_numbers<[1], [0], [0], [1], [0, 0, 1, 1], [], []>} : vector<15x64xbf16>, vector<64x128xbf16>, vector<15x128xf32> -> vector<15x128xf32>
    %29 = vector.extract_strided_slice %24 {offsets = [1, 0], sizes = [15, 64], strides = [1, 1]} : vector<17x64xbf16> to vector<15x64xbf16>
    %c1_18 = arith.constant 1 : index
    %c0_19 = arith.constant 0 : index
    %c0_20 = arith.constant 0 : index
    %30 = vector.load %arg4[%c1_18, %c0_19, %c0_20] : memref<3x64x128xbf16, #tpu.memory_space<vmem>>, vector<1x64x128xbf16>
    %31 = vector.shape_cast %30 : vector<1x64x128xbf16> to vector<64x128xbf16>
    %cst_21 = arith.constant dense<0.000000e+00> : vector<15x128xf32>
    %32 = tpu.matmul %29, %31, %cst_21 {dimension_numbers = #tpu.dot_dimension_numbers<[1], [0], [0], [1], [0, 0, 1, 1], [], []>} : vector<15x64xbf16>, vector<64x128xbf16>, vector<15x128xf32> -> vector<15x128xf32>
    %33 = arith.addf %28, %32 : vector<15x128xf32>
    %34 = vector.extract_strided_slice %24 {offsets = [2, 0], sizes = [15, 64], strides = [1, 1]} : vector<17x64xbf16> to vector<15x64xbf16>
    %c2_22 = arith.constant 2 : index
    %c0_23 = arith.constant 0 : index
    %c0_24 = arith.constant 0 : index
    %35 = vector.load %arg4[%c2_22, %c0_23, %c0_24] : memref<3x64x128xbf16, #tpu.memory_space<vmem>>, vector<1x64x128xbf16>
    %36 = vector.shape_cast %35 : vector<1x64x128xbf16> to vector<64x128xbf16>
    %cst_25 = arith.constant dense<0.000000e+00> : vector<15x128xf32>
    %37 = tpu.matmul %34, %36, %cst_25 {dimension_numbers = #tpu.dot_dimension_numbers<[1], [0], [0], [1], [0, 0, 1, 1], [], []>} : vector<15x64xbf16>, vector<64x128xbf16>, vector<15x128xf32> -> vector<15x128xf32>
    %38 = arith.addf %33, %37 : vector<15x128xf32>
    %c0_26 = arith.constant 0 : index
    %c0_27 = arith.constant 0 : index
    %39 = vector.load %arg5[%c0_26, %c0_27] : memref<1x128xf32, #tpu.memory_space<vmem>>, vector<1x128xf32>
    %40 = vector.broadcast %39 : vector<1x128xf32> to vector<15x128xf32>
    %41 = arith.addf %38, %40 : vector<15x128xf32>
    %cst_28 = arith.constant 0.000000e+00 : f32
    %42 = vector.broadcast %cst_28 : f32 to vector<15x128xf32>
    %43 = arith.maximumf %41, %42 : vector<15x128xf32>
    %44 = vector.extract_strided_slice %43 {offsets = [0, 0], sizes = [14, 128], strides = [1, 1]} : vector<15x128xf32> to vector<14x128xf32>
    %45 = vector.extract_strided_slice %43 {offsets = [1, 0], sizes = [14, 128], strides = [1, 1]} : vector<15x128xf32> to vector<14x128xf32>
    %46 = arith.maximumf %44, %45 : vector<14x128xf32>
    %47 = arith.truncf %46 : vector<14x128xf32> to vector<14x128xbf16>
    %48 = vector.extract_strided_slice %47 {offsets = [0, 0], sizes = [12, 128], strides = [1, 1]} : vector<14x128xbf16> to vector<12x128xbf16>
    %c0_29 = arith.constant 0 : index
    %c0_30 = arith.constant 0 : index
    %c0_31 = arith.constant 0 : index
    %49 = vector.load %arg6[%c0_29, %c0_30, %c0_31] : memref<3x128x256xbf16, #tpu.memory_space<vmem>>, vector<1x128x256xbf16>
    %50 = vector.shape_cast %49 : vector<1x128x256xbf16> to vector<128x256xbf16>
    %cst_32 = arith.constant dense<0.000000e+00> : vector<12x256xf32>
    %51 = tpu.matmul %48, %50, %cst_32 {dimension_numbers = #tpu.dot_dimension_numbers<[1], [0], [0], [1], [0, 0, 1, 1], [], []>} : vector<12x128xbf16>, vector<128x256xbf16>, vector<12x256xf32> -> vector<12x256xf32>
    %52 = vector.extract_strided_slice %47 {offsets = [1, 0], sizes = [12, 128], strides = [1, 1]} : vector<14x128xbf16> to vector<12x128xbf16>
    %c1_33 = arith.constant 1 : index
    %c0_34 = arith.constant 0 : index
    %c0_35 = arith.constant 0 : index
    %53 = vector.load %arg6[%c1_33, %c0_34, %c0_35] : memref<3x128x256xbf16, #tpu.memory_space<vmem>>, vector<1x128x256xbf16>
    %54 = vector.shape_cast %53 : vector<1x128x256xbf16> to vector<128x256xbf16>
    %cst_36 = arith.constant dense<0.000000e+00> : vector<12x256xf32>
    %55 = tpu.matmul %52, %54, %cst_36 {dimension_numbers = #tpu.dot_dimension_numbers<[1], [0], [0], [1], [0, 0, 1, 1], [], []>} : vector<12x128xbf16>, vector<128x256xbf16>, vector<12x256xf32> -> vector<12x256xf32>
    %56 = arith.addf %51, %55 : vector<12x256xf32>
    %57 = vector.extract_strided_slice %47 {offsets = [2, 0], sizes = [12, 128], strides = [1, 1]} : vector<14x128xbf16> to vector<12x128xbf16>
    %c2_37 = arith.constant 2 : index
    %c0_38 = arith.constant 0 : index
    %c0_39 = arith.constant 0 : index
    %58 = vector.load %arg6[%c2_37, %c0_38, %c0_39] : memref<3x128x256xbf16, #tpu.memory_space<vmem>>, vector<1x128x256xbf16>
    %59 = vector.shape_cast %58 : vector<1x128x256xbf16> to vector<128x256xbf16>
    %cst_40 = arith.constant dense<0.000000e+00> : vector<12x256xf32>
    %60 = tpu.matmul %57, %59, %cst_40 {dimension_numbers = #tpu.dot_dimension_numbers<[1], [0], [0], [1], [0, 0, 1, 1], [], []>} : vector<12x128xbf16>, vector<128x256xbf16>, vector<12x256xf32> -> vector<12x256xf32>
    %61 = arith.addf %56, %60 : vector<12x256xf32>
    %c0_41 = arith.constant 0 : index
    %c0_42 = arith.constant 0 : index
    %62 = vector.load %arg7[%c0_41, %c0_42] : memref<1x256xf32, #tpu.memory_space<vmem>>, vector<1x256xf32>
    %63 = vector.broadcast %62 : vector<1x256xf32> to vector<12x256xf32>
    %64 = arith.addf %61, %63 : vector<12x256xf32>
    %cst_43 = arith.constant 0.000000e+00 : f32
    %65 = vector.broadcast %cst_43 : f32 to vector<12x256xf32>
    %66 = arith.maximumf %64, %65 : vector<12x256xf32>
    %67 = vector.extract_strided_slice %66 {offsets = [0, 0], sizes = [11, 256], strides = [1, 1]} : vector<12x256xf32> to vector<11x256xf32>
    %68 = vector.extract_strided_slice %66 {offsets = [1, 0], sizes = [11, 256], strides = [1, 1]} : vector<12x256xf32> to vector<11x256xf32>
    %69 = arith.maximumf %67, %68 : vector<11x256xf32>
    %70 = arith.truncf %69 : vector<11x256xf32> to vector<11x256xbf16>
    %71 = vector.extract_strided_slice %70 {offsets = [0, 0], sizes = [9, 256], strides = [1, 1]} : vector<11x256xbf16> to vector<9x256xbf16>
    %c0_44 = arith.constant 0 : index
    %c0_45 = arith.constant 0 : index
    %c0_46 = arith.constant 0 : index
    %72 = vector.load %arg8[%c0_44, %c0_45, %c0_46] : memref<3x256x128xbf16, #tpu.memory_space<vmem>>, vector<1x256x128xbf16>
    %73 = vector.shape_cast %72 : vector<1x256x128xbf16> to vector<256x128xbf16>
    %cst_47 = arith.constant dense<0.000000e+00> : vector<9x128xf32>
    %74 = tpu.matmul %71, %73, %cst_47 {dimension_numbers = #tpu.dot_dimension_numbers<[1], [0], [0], [1], [0, 0, 1, 1], [], []>} : vector<9x256xbf16>, vector<256x128xbf16>, vector<9x128xf32> -> vector<9x128xf32>
    %75 = vector.extract_strided_slice %70 {offsets = [1, 0], sizes = [9, 256], strides = [1, 1]} : vector<11x256xbf16> to vector<9x256xbf16>
    %c1_48 = arith.constant 1 : index
    %c0_49 = arith.constant 0 : index
    %c0_50 = arith.constant 0 : index
    %76 = vector.load %arg8[%c1_48, %c0_49, %c0_50] : memref<3x256x128xbf16, #tpu.memory_space<vmem>>, vector<1x256x128xbf16>
    %77 = vector.shape_cast %76 : vector<1x256x128xbf16> to vector<256x128xbf16>
    %cst_51 = arith.constant dense<0.000000e+00> : vector<9x128xf32>
    %78 = tpu.matmul %75, %77, %cst_51 {dimension_numbers = #tpu.dot_dimension_numbers<[1], [0], [0], [1], [0, 0, 1, 1], [], []>} : vector<9x256xbf16>, vector<256x128xbf16>, vector<9x128xf32> -> vector<9x128xf32>
    %79 = arith.addf %74, %78 : vector<9x128xf32>
    %80 = vector.extract_strided_slice %70 {offsets = [2, 0], sizes = [9, 256], strides = [1, 1]} : vector<11x256xbf16> to vector<9x256xbf16>
    %c2_52 = arith.constant 2 : index
    %c0_53 = arith.constant 0 : index
    %c0_54 = arith.constant 0 : index
    %81 = vector.load %arg8[%c2_52, %c0_53, %c0_54] : memref<3x256x128xbf16, #tpu.memory_space<vmem>>, vector<1x256x128xbf16>
    %82 = vector.shape_cast %81 : vector<1x256x128xbf16> to vector<256x128xbf16>
    %cst_55 = arith.constant dense<0.000000e+00> : vector<9x128xf32>
    %83 = tpu.matmul %80, %82, %cst_55 {dimension_numbers = #tpu.dot_dimension_numbers<[1], [0], [0], [1], [0, 0, 1, 1], [], []>} : vector<9x256xbf16>, vector<256x128xbf16>, vector<9x128xf32> -> vector<9x128xf32>
    %84 = arith.addf %79, %83 : vector<9x128xf32>
    %c0_56 = arith.constant 0 : index
    %c0_57 = arith.constant 0 : index
    %85 = vector.load %arg9[%c0_56, %c0_57] : memref<1x128xf32, #tpu.memory_space<vmem>>, vector<1x128xf32>
    %86 = vector.broadcast %85 : vector<1x128xf32> to vector<9x128xf32>
    %87 = arith.addf %84, %86 : vector<9x128xf32>
    %cst_58 = arith.constant 0.000000e+00 : f32
    %88 = vector.broadcast %cst_58 : f32 to vector<9x128xf32>
    %89 = arith.maximumf %87, %88 : vector<9x128xf32>
    %90 = vector.extract_strided_slice %89 {offsets = [0, 0], sizes = [8, 128], strides = [1, 1]} : vector<9x128xf32> to vector<8x128xf32>
    %91 = vector.extract_strided_slice %89 {offsets = [1, 0], sizes = [8, 128], strides = [1, 1]} : vector<9x128xf32> to vector<8x128xf32>
    %92 = arith.maximumf %90, %91 : vector<8x128xf32>
    %cst_59 = arith.constant dense<0.000000e+00> : vector<128xf32>
    %93 = vector.multi_reduction <add>, %92, %cst_59 [0] : vector<8x128xf32> to vector<128xf32>
    %94 = vector.shape_cast %93 : vector<128xf32> to vector<1x128xf32>
    %95 = arith.truncf %94 : vector<1x128xf32> to vector<1x128xbf16>
    %c0_60 = arith.constant 0 : index
    %c0_61 = arith.constant 0 : index
    %96 = vector.load %arg10[%c0_60, %c0_61] : memref<128x8xbf16, #tpu.memory_space<vmem>>, vector<128x8xbf16>
    %cst_62 = arith.constant dense<0.000000e+00> : vector<1x8xf32>
    %97 = tpu.matmul %95, %96, %cst_62 {dimension_numbers = #tpu.dot_dimension_numbers<[1], [0], [0], [1], [0, 0, 1, 1], [], []>} : vector<1x128xbf16>, vector<128x8xbf16>, vector<1x8xf32> -> vector<1x8xf32>
    %c0_63 = arith.constant 0 : index
    %c0_64 = arith.constant 0 : index
    %98 = vector.load %arg11[%c0_63, %c0_64] : memref<1x8xf32, #tpu.memory_space<vmem>>, vector<1x8xf32>
    %99 = arith.addf %97, %98 : vector<1x8xf32>
    %c0_65 = arith.constant 0 : index
    %c0_66 = arith.constant 0 : index
    %c0_67 = arith.constant 0 : index
    %100 = vector.load %arg12[%c0_65, %c0_66, %c0_67] : memref<1x1x8xf32, #tpu.memory_space<vmem>>, vector<1x1x8xf32>
    %101 = vector.shape_cast %100 : vector<1x1x8xf32> to vector<1x8xf32>
    %102 = vector.shape_cast %99 : vector<1x8xf32> to vector<1x1x8xf32>
    tpu.vector_store %arg12[%c0_65, %c0_66, %c0_67], %102 {strides = array<i32>} : memref<1x1x8xf32, #tpu.memory_space<vmem>>, vector<1x1x8xf32>,
    return
  }
  func.func @transform_0(%arg0: i32) -> (i32, i32, i32) {
    %c0_i32 = arith.constant 0 : i32
    %c0_i32_0 = arith.constant 0 : i32
    %c0_i32_1 = arith.constant 0 : i32
    return %arg0, %c0_i32, %c0_i32_0 : i32, i32, i32
  }
  func.func @transform_1(%arg0: i32) -> (i32, i32, i32) {
    %c0_i32 = arith.constant 0 : i32
    %c0_i32_0 = arith.constant 0 : i32
    %c0_i32_1 = arith.constant 0 : i32
    %c0_i32_2 = arith.constant 0 : i32
    return %c0_i32, %c0_i32_0, %c0_i32_1 : i32, i32, i32
  }
  func.func @transform_2(%arg0: i32) -> (i32, i32) {
    %c0_i32 = arith.constant 0 : i32
    %c0_i32_0 = arith.constant 0 : i32
    %c0_i32_1 = arith.constant 0 : i32
    return %c0_i32, %c0_i32_0 : i32, i32
  }
  func.func @transform_3(%arg0: i32) -> (i32, i32, i32) {
    %c0_i32 = arith.constant 0 : i32
    %c0_i32_0 = arith.constant 0 : i32
    %c0_i32_1 = arith.constant 0 : i32
    %c0_i32_2 = arith.constant 0 : i32
    return %c0_i32, %c0_i32_0, %c0_i32_1 : i32, i32, i32
  }
  func.func @transform_4(%arg0: i32) -> (i32, i32) {
    %c0_i32 = arith.constant 0 : i32
    %c0_i32_0 = arith.constant 0 : i32
    %c0_i32_1 = arith.constant 0 : i32
    return %c0_i32, %c0_i32_0 : i32, i32
  }
  func.func @transform_5(%arg0: i32) -> (i32, i32, i32) {
    %c0_i32 = arith.constant 0 : i32
    %c0_i32_0 = arith.constant 0 : i32
    %c0_i32_1 = arith.constant 0 : i32
    %c0_i32_2 = arith.constant 0 : i32
    return %c0_i32, %c0_i32_0, %c0_i32_1 : i32, i32, i32
  }
  func.func @transform_6(%arg0: i32) -> (i32, i32) {
    %c0_i32 = arith.constant 0 : i32
    %c0_i32_0 = arith.constant 0 : i32
    %c0_i32_1 = arith.constant 0 : i32
    return %c0_i32, %c0_i32_0 : i32, i32
  }
  func.func @transform_7(%arg0: i32) -> (i32, i32, i32) {
    %c0_i32 = arith.constant 0 : i32
    %c0_i32_0 = arith.constant 0 : i32
    %c0_i32_1 = arith.constant 0 : i32
    %c0_i32_2 = arith.constant 0 : i32
    return %c0_i32, %c0_i32_0, %c0_i32_1 : i32, i32, i32
  }
  func.func @transform_8(%arg0: i32) -> (i32, i32) {
    %c0_i32 = arith.constant 0 : i32
    %c0_i32_0 = arith.constant 0 : i32
    %c0_i32_1 = arith.constant 0 : i32
    return %c0_i32, %c0_i32_0 : i32, i32
  }
  func.func @transform_9(%arg0: i32) -> (i32, i32) {
    %c0_i32 = arith.constant 0 : i32
    %c0_i32_0 = arith.constant 0 : i32
    %c0_i32_1 = arith.constant 0 : i32
    return %c0_i32, %c0_i32_0 : i32, i32
  }
  func.func @transform_10(%arg0: i32) -> (i32, i32) {
    %c0_i32 = arith.constant 0 : i32
    %c0_i32_0 = arith.constant 0 : i32
    %c0_i32_1 = arith.constant 0 : i32
    return %c0_i32, %c0_i32_0 : i32, i32
  }
  func.func @transform_11(%arg0: i32) -> (i32, i32, i32) {
    %c0_i32 = arith.constant 0 : i32
    %c0_i32_0 = arith.constant 0 : i32
    %c0_i32_1 = arith.constant 0 : i32
    return %arg0, %c0_i32, %c0_i32_0 : i32, i32, i32
  }
}

</mosaic_0001>

<bundles_post_ra>
// kernel: audio_cnn_pool_forward.1
= control target key start
LH: loop header
LB: loop body
LE: loop exit
PB: predicated region body
PF: predicated region fallthrough
CT: control target
= control target key end

     0   :  { %16 = vsyncpa [#allocation3], 0  ;;  %s3411_s0 = inlined_call_operand.vmem [shape: bf16[2,20,10], index: 0, kind: input, shape index: {}]   ;;  %s3412_s1 = inlined_call_operand.vmem [shape: bf16[3,10,64], index: 1, kind: input, shape index: {}]   ;;  %s3413_s2 = inlined_call_operand.vmem [shape: f32[1,64], index: 2, kind: input, shape index: {}]   ;;  %s3414_s3 = inlined_call_operand.vmem [shape: bf16[3,64,128], index: 3, kind: input, shape index: {}]   ;;  %s3415_s4 = inlined_call_operand.vmem [shape: f32[1,128], index: 4, kind: input, shape index: {}]   ;;  %s3416_s5 = inlined_call_operand.vmem [shape: bf16[3,128,256], index: 5, kind: input, shape index: {}]   ;;  %s3417_s6 = inlined_call_operand.vmem [shape: f32[1,256], index: 6, kind: input, shape index: {}]   ;;  %s3418_s7 = inlined_call_operand.vmem [shape: bf16[3,256,128], index: 7, kind: input, shape index: {}]   ;;  %s3419_s8 = inlined_call_operand.vmem [shape: f32[1,128], index: 8, kind: input, shape index: {}]   ;;  %s3420_s9 = inlined_call_operand.vmem [shape: bf16[128,8], index: 9, kind: input, shape index: {}]   ;;  %s3421_s10 = inlined_call_operand.vmem [shape: f32[1,8], index: 10, kind: input, shape index: {}]   ;;  %s3422_s11 = inlined_call_operand.hbm [shape: f32[2,1,8], index: 11, kind: output, shape index: {}]  }
   0x1   :  { %18 = vsyncpa [#allocation3 + $0x1], 0  ;;  %s2872_s17 = smov 0   ;;  %s2874_s18 = smov 0  }
   0x2   :  { %s2876_s19 = smov 0   ;;  %s2878_s20 = smov 0  }
   0x3 LB: > { %s2893_s21 = sadd.s32 4294967295, %s2806_s20   ;;  %s2115_s22 = sadd.s32 4294967294, %s2806_s20   ;;  %s2806_s20 = sphi %s2878_s20, %s3428_s20   ;;  %s2802_s19 = sphi %s2876_s19, %s3427_s19   ;;  %s2798_s18 = sphi %s2874_s18, %s3426_s18   ;;  %s2794_s17 = sphi %s2872_s17, %s3425_s17  }
   0x4   : > { %s2897_s23 = sadd.s32 1, %s2806_s20   ;;  %s267_s24 = sadd.s32 1, %s2802_s19 }
   0x5   : > { %s264_s25 = ssub.s32 %s2806_s20, %s2897_s23  ;;  %p277_p0 = scmp.ne.s32.totalorder %s2802_s19, %s2798_s18 }
   0x6   : > { %p265_p1 = scmp.eq.s32.totalorder %s264_s25, 0  ;;  %p278_p2 = scmp.eq.s32.totalorder %s2893_s21, 1 }
   0x7   : > { %p283_p3 = scmp.ne.s32.totalorder %s2798_s18, %s2794_s17  ;;  %p284_p4 = scmp.eq.s32.totalorder %s2115_s22, 1 }
   0x8   : > { %s2908_s26 = scalar_select %p265_p1, %s2802_s19, %s267_s24  }
   0x9   : > { %p2910_p5 = por %p278_p2, %p277_p0  ;;  %p2914_p6 = por %p284_p4, %p283_p3 }
   0xa   : > { %p2118_p7 = scmp.ge.s32.totalorder %s2806_s20, 1  ;;  %p340_p8 = scmp.lt.s32.totalorder %s2806_s20, 3 }
   0xc   : > { %p341_p9 = pnand %p2118_p7, %p340_p8 }
   0xd   : > { %v2599_v0 = vld [vmem:[%s3412_s1 + $0x8] sm:$0x1f] (!%p341_p9)   ;;  %vm429_vm0 = vcmask (!%p341_p9), 1044480   ;;  %p379_p10 = scmp.lt.s32.totalorder (!%p341_p9), %s2893_s21, 1  ;;  %v2602_v2 = vld [vmem:[%s3412_s1] sm:$0x1f] (!%p341_p9)  }
   0xe   : > { %344 = sbr.rel (%p341_p9) target bundleno = 1359 (0x54f), region = 64  ;;  %2553 = vmatprep.subr.msk.bf16.mxu1 (!%p341_p9), %vm429_vm0, %v2599_v0  ;;  %v431_v1 = vsel (!%p341_p9), %vm429_vm0, %v2599_v0, 0  ;;  %v2603_v3 = vld [vmem:[%s3412_s1 + $0x10] sm:$0x1f] (!%p341_p9)   ;;  %vm544_vm1 = vcmask (!%p341_p9), 1046528   ;;  %vm422_vm3 = vcmask (!%p341_p9), 80896  }
   0xf   : > { %2472 = vmatpush3.bf16.msra.mxu1 (!%p341_p9), %v431_v1  ;;  %vm401_vm2 = vsmask.f32 (!%p341_p9), 7424  ;;  %2555 = vmatprep.subr.msk.bf16.mxu0 (!%p341_p9), %vm429_vm0, %v2603_v3  ;;  %v560_v4 = vsel (!%p341_p9), %vm429_vm0, %v2603_v3, 0  ;;  %v491_v19 = vsel (!%p341_p9), %vm429_vm0, %v2602_v2, 0  ;;  %v2604_v20 = vld [vmem:[%s3414_s3] sm:$0xff] (!%p341_p9)   ;;  %v2808_v21 = vmov (!%p341_p9), 0.0  }
  0x10   : > { %2554 = vmatprep.subr.msk.bf16.mxu1 (!%p341_p9), %vm429_vm0, %v2602_v2  ;;  %2484 = vmatpush3.bf16.msra.mxu0 (!%p341_p9), %v560_v4  ;;  %v2605_v22 = vld [vmem:[%s3414_s3 + $0x8] sm:$0xff] (!%p341_p9)   ;;  %v2606_v23 = vld [vmem:[%s3414_s3 + $0x20] sm:$0xff] (!%p341_p9)   ;;  %v2607_v24 = vld [vmem:[%s3414_s3 + $0x10] sm:$0xff] (!%p341_p9)   ;;  %vm2809_vm4 = vmmov (!%p341_p9), 0   ;;  %vm691_vm5 = vcmask (!%p341_p9), 523264   ;;  %s377_s30 = sand.u32 (!%p341_p9), 1, %s2798_s18  }
  0x11   : > { %2501 = vmatprep.subr.bf16.mxu0 (!%p341_p9), %v2808_v21  ;;  %v2608_v25 = vld [vmem:[%s3414_s3 + $0x28] sm:$0xff] (!%p341_p9)   ;;  %v2609_v26 = vld [vmem:[%s3414_s3 + $0x18] sm:$0xff] (!%p341_p9)   ;;  %v2610_v27 = vld [vmem:[%s3414_s3 + $0x30] sm:$0xff] (!%p341_p9)   ;;  %s2369_s14 = sshll.u32 (!%p341_p9), %s2893_s21, 4  ;;  %s378_s15 = scalar_lea.vmem (!%p341_p9), [#allocation2], %s377_s30  ;;  %vm2045_vm6 = vcmask (!%p341_p9), 57344  }
  0x12   : > { %v2611_v28 = vld [vmem:[%s3414_s3 + $0x38] sm:$0xff] (!%p341_p9)   ;;  %v2135_v40 = vld [vmem:[%s3413_s2] ss:$0 sm:$0xff] (!%p341_p9)  ;;  %s2060_s16 = sshll.u32 (!%p341_p9), %s378_s15, 4  ;;  %s3369_s25 = scalar_lea.hbm (!%p341_p9), %s3422_s11, %s2369_s14  ;;  %s3371_s16 = int_to_ptr.vmem [resolvable:$true] %s2060_s16 }
  0x15   : > { %s380_s12 = scalar_select %p379_p10, %s2893_s21, 1 }
  0x16   : > { %s2048_s21 = scalar_lea.sflag [#allocation3], %s377_s30 }
  0x17   : > { %s2556_s22 = smul.u32 12, %s380_s12  ;;  %s2811_s12 = smov [#allocation2]  }
  0x18   : > { %s2748_s13 = sshll.u32 %s2811_s12, 4  ;;  %s2749_s13 = int_to_ptr.vmem [resolvable:$false] %s2748_s13 }
  0x19   : > { %s383_s29 = scalar_lea.vmem %s3411_s0, %s2556_s22  ;;  %s2750_s22 = scalar_lea.vmem %s2749_s13, 32 }
  0x1a   : > { %v2600_v5 = vld [vmem:[%s383_s29] sm:$0xff]   ;;  %v2601_v6 = vld [vmem:[%s383_s29 + $0x8] ss:$0 sps:$4 sm:$0x33]   ;;  %s2744_s29 = scalar_lea.vmem %s3371_s16, 16  ;;  %p2751_p0 = scmp.lt.s32.totalorder %s3371_s16, %s2749_s13 }
  0x1b   : > { %v403_v7 = vshrl.u32 %v2600_v5, 16  ;;  %v405_v8 = vshll.u32 %v2600_v5, 16  ;;  %v410_v9 = vshll.u32 %v2601_v6, 16  ;;  %v414_v10 = vshrl.u32 %v2601_v6, 16  ;;  %p2745_p11 = scmp.ne.s32.totalorder %s3371_s16, %s2744_s29  ;;  %p2752_p1 = scmp.lt.s32.totalorder %s2750_s22, %s2744_s29 }
  0x1c   : > { %v545_v11 = vrot.slane %v2600_v5, 1  ;;  %v546_v12 = vrot.slane %v2601_v6, 1 }
  0x1d   : > { %v407_v13 = vrot.slane %v405_v8, 1  ;;  %v412_v14 = vrot.slane %v410_v9, 1  ;;  %v2613_v8 = vld [vmem:[%s3414_s3 + $0x48] sm:$0xff]   ;;  %v2614_v9 = vld [vmem:[%s3414_s3 + $0x50] sm:$0xff]   ;;  %p2746_p12 = pnand %p2745_p11, %p2910_p5  ;;  %p2753_p2 = por %p2752_p1, %p2751_p0 }
  0x1e   : > { %v547_v15 = vsel %vm544_vm1, %v545_v11, %v546_v12  ;;  %v2616_v11 = vld [vmem:[%s3416_s5 + $0x80] ss:$8 sps:$4 sm:$0xff]  }
  0x1f   : > { %v408_v16 = vor.u32 %v407_v13, %v403_v7  ;;  %v416_v17 = vor.u32 %v414_v10, %v412_v14  ;;  %2485 = vmatprep.mubr.msk.bf16.mxu0 %vm422_vm3, %v547_v15  ;;  %v2615_v10 = vld [vmem:[%s3414_s3 + $0x58] sm:$0xff]   ;;  %v2624_v15 = vld [vmem:[%s3416_s5 + $0xa4] ss:$8 sps:$4 sm:$0xff]   ;;  %p2747_p13 = pneg %p2746_p12 }
  0x20   : > { %2486 = vmatmul.mubr.msk.bf16.vlgmr.msra.gmra.mrb[0].mxu0 %vm422_vm3, %v546_v12  ;;  %v2618_v12 = vld [vmem:[%s3416_s5 + $0x84] ss:$8 sps:$4 sm:$0xff]   ;;  %v2621_v13 = vld [vmem:[%s3416_s5 + $0x94] ss:$8 sps:$4 sm:$0xff]  }
  0x21   : > { %v413_v18 = vsel %vm401_vm2, %v408_v16, %v412_v14  ;;  %2502 = vmatpush3.bf16.msra.mxu0 %v2604_v20  ;;  %2509 = vmatprep.mubr.msk.bf16.mxu0 %vm2809_vm4, %v2808_v21  ;;  %v2619_v14 = vld [vmem:[%s3416_s5 + $0x90] ss:$8 sps:$4 sm:$0xff]   ;;  %v2622_v16 = vld [vmem:[%s3416_s5 + $0xa0] ss:$8 sps:$4 sm:$0xff]   ;;  %p2754_p3 = pnand %p2753_p2, %p2747_p13 }
  0x22   : > { %2473 = vmatprep.mubr.msk.bf16.mxu1 %vm422_vm3, %v413_v18  ;;  %2503 = vmatprep.subr.bf16.mxu0 %v2808_v21  ;;  %v2625_v18 = vld [vmem:[%s3416_s5 + $0xb0] ss:$8 sps:$4 sm:$0xff]   ;;  %v2628_v20 = vld [vmem:[%s3416_s5 + $0xc0] ss:$8 sps:$4 sm:$0xff]  }
  0x23   : > { %2474 = vmatmul.mubr.msk.bf16.vlgmr.msra.gmra.mrb[0].mxu1 %vm422_vm3, %v416_v17  ;;  %v2627_v17 = vld [vmem:[%s3416_s5 + $0xb4] ss:$8 sps:$4 sm:$0xff]  }
  0x24   : > { %2478 = vmatpush3.bf16.msra.mxu1 %v491_v19  ;;  %2479 = vmatprep.mubr.msk.bf16.mxu1 %vm422_vm3, %v2600_v5  ;;  %v2630_v19 = vld [vmem:[%s3416_s5 + $0xc4] ss:$8 sps:$4 sm:$0xff]  }
  0x25   : > { %2489 = vmatprep.subr.bf16.mxu1 %v2808_v21  ;;  %2504 = vmatpush3.bf16.msra.mxu0 %v2605_v22  ;;  %v2633_v22 = vld [vmem:[%s3416_s5 + $0xd4] ss:$8 sps:$4 sm:$0xff]  }
  0x26   : > { %2505 = vmatprep.subr.bf16.mxu0 %v2808_v21 }
  0x29   : > { %2506 = vmatpush3.bf16.msra.mxu0 %v2607_v24  ;;  %v2636_v24 = vld [vmem:[%s3416_s5 + $0xe4] ss:$8 sps:$4 sm:$0xff]  }
  0x2a   : > { %2507 = vmatprep.subr.bf16.mxu0 %v2808_v21 }
  0x2b   : > { %2480 = vmatmul.mubr.msk.bf16.vlgmr.msra.gmra.mrb[4].mxu1 %vm422_vm3, %v2601_v6  ;;  %v2612_v6 = vld [vmem:[%s3414_s3 + $0x40] sm:$0xff]  }
  0x2c   : > { %2490 = vmatpush3.bf16.msra.mxu1 %v2606_v23  ;;  %2497 = vmatprep.mubr.msk.bf16.mxu1 %vm2809_vm4, %v2808_v21  ;;  %v2631_v23 = vld [vmem:[%s3416_s5 + $0xd0] ss:$8 sps:$4 sm:$0xff]  }
  0x2d   : > { %2491 = vmatprep.subr.bf16.mxu1 %v2808_v21  ;;  %2508 = vmatpush3.bf16.msra.mxu0 %v2609_v26  ;;  %v2637_v26 = vld [vmem:[%s3416_s5 + $0xf0] ss:$8 sps:$4 sm:$0xff]  }
  0x2e   : > { %1029 = vmatprep.subr.bf16.mxu0 %v2618_v12  ;;  %v2657_v12 = vld [vmem:[%s3416_s5 + $0x54] ss:$8 sps:$4 sm:$0xff]  }
  0x30   : > { %2492 = vmatpush3.bf16.msra.mxu1 %v2608_v25  ;;  %v2634_v25 = vld [vmem:[%s3416_s5 + $0xe0] ss:$8 sps:$4 sm:$0xff]  }
  0x31   : > { %2493 = vmatprep.subr.bf16.mxu1 %v2808_v21 }
  0x34   : > { %2494 = vmatpush3.bf16.msra.mxu1 %v2610_v27  ;;  %v2639_v27 = vld [vmem:[%s3416_s5 + $0xf4] ss:$8 sps:$4 sm:$0xff]  }
  0x35   : > { %2495 = vmatprep.subr.bf16.mxu1 %v2808_v21 }
  0x38   : > { %2496 = vmatpush3.bf16.msra.mxu1 %v2611_v28  ;;  %v2810_v28 = vmov 0  }
  0x39   : > { %2513 = vmatprep.subr.bf16.mxu1 %v2808_v21 }
  0xf3   : > { %v2487_v29 = vpop.f32.mrb[0].mxu0 }
  0xf4   : > { %v596_v30 = vpop.f32.mrb[1].mxu0 }
  0xf5   : > { %v2488_v31 = vpop.f32.mrb[2].mxu0 }
  0xf6   : > { %v2475_v32 = vpop.f32.mrb[0].mxu1  ;;  %v599_v33 = vpop.f32.mrb[3].mxu0  ;;  %v2689_v31 = vld [vmem:[%s3418_s7 + $0x80] sm:$0xff]  }
  0xf7   : > { %v467_v34 = vpop.f32.mrb[1].mxu1 }
  0xf8   : > { %v2476_v35 = vpop.f32.mrb[2].mxu1 }
  0xf9   : > { %v470_v36 = vpop.f32.mrb[3].mxu1  ;;  %v2693_v35 = vld [vmem:[%s3418_s7 + $0x90] sm:$0xff]  }
  0xfe   : > { %v2481_v37 = vpop.f32.mrb[4].mxu1 }
  0xff   : > { %v536_v38 = vadd.f32 %v2481_v37, %v2475_v32  ;;  %v527_v39 = vpop.f32.mrb[5].mxu1  ;;  %v2690_v32 = vld [vmem:[%s3418_s7 + $0xc8] sm:$0xff]  }
 0x100   : > { %v528_v41 = vadd.f32 %v527_v39, %v467_v34  ;;  %v2482_v42 = vpop.f32.mrb[6].mxu1  ;;  %v2692_v34 = vld [vmem:[%s3418_s7 + $0xd0] sm:$0xff]  }
 0x101   : > { %v612_v43 = vadd.f32 %v2487_v29, %v536_v38  ;;  %v530_v44 = vpop.f32.mrb[7].mxu1  ;;  %v2642_v29 = vld [vmem:[%s3416_s5 + $0x4] ss:$8 sps:$4 sm:$0xff]  }
 0x102   : > { %v610_v45 = vadd.f32 %v596_v30, %v528_v41  ;;  %v531_v46 = vadd.f32 %v530_v44, %v470_v36  ;;  %v2688_v30 = vld [vmem:[%s3418_s7 + $0xc0] sm:$0xff]  }
 0x103   : > { %v622_v47 = vadd.f32 %v2135_v40, %v612_v43 }
 0x104   : > { %v620_v48 = vadd.f32 %v2135_v40, %v610_v45  ;;  %v611_v49 = vadd.f32 %v599_v33, %v531_v46  ;;  %v2691_v33 = vld [vmem:[%s3418_s7 + $0x88] sm:$0xff]  }
 0x105   : > { %v625_v50 = vmax.f32 %v622_v47, 0.0  ;;  %v2167_v47 = vld [vmem:[%s3415_s4] ss:$0 sm:$0xff] }
 0x106   : > { %v623_v51 = vmax.f32 %v620_v48, 0.0  ;;  %v621_v52 = vadd.f32 %v2135_v40, %v611_v49 }
 0x107   : > { %v633_v53 = vrot.slane %v625_v50, 1 }
 0x108   : > { %v624_v54 = vmax.f32 %v621_v52, 0.0  ;;  %v630_v56 = vrot.slane %v623_v51, 1 }
 0x109   : > { %v640_v55 = vmax.f32 %v625_v50, %v633_v53 }
 0x10a   : > { %v631_v57 = vrot.slane %v624_v54, 1 }
 0x10b   : > { %v642_v60 = vpack.c.bf16 %v640_v55, %v640_v55 }
 0x10c   : > { %v632_v58 = vsel %vm544_vm1, %v630_v56, %v631_v57  ;;  %v634_v59 = vsel %vm544_vm1, %v631_v57, %v633_v53 }
 0x10d   : > { %v638_v61 = vmax.f32 %v623_v51, %v632_v58  ;;  %v639_v62 = vmax.f32 %v624_v54, %v634_v59  ;;  %v815_v0 = vrot.slane %v642_v60, 1 }
 0x10f   : > { %v641_v63 = vpack.c.bf16 %v639_v62, %v638_v61 }
 0x111   : > { %2510 = vmatmul.mubr.msk.bf16.vlgmr.msra.gmra.mrb[4].mxu0 %vm691_vm5, %v641_v63  ;;  %v663_v1 = vshll.u32 %v641_v63, 16  ;;  %v814_v2 = vrot.slane %v641_v63, 1  ;;  %v661_v3 = vshrl.u32 %v641_v63, 16 }
 0x112   : > { %1030 = vmatpush1.bf16.msra.mxu0 %v2616_v11  ;;  %1061 = vmatprep.mubr.bf16.mxu0 %v2810_v28  ;;  %v2652_v11 = vld [vmem:[%s3416_s5 + $0x40] ss:$8 sps:$4 sm:$0xff]  }
 0x113   : > { %v665_v4 = vrot.slane %v663_v1, 1  ;;  %v816_v5 = vsel %vm544_vm1, %v814_v2, %v815_v0  ;;  %1031 = vmatprep.subr.bf16.mxu0 %v2621_v13  ;;  %v2640_v2 = vld [vmem:[%s3416_s5] ss:$8 sps:$4 sm:$0xff]   ;;  %v2655_v13 = vld [vmem:[%s3416_s5 + $0x50] ss:$8 sps:$4 sm:$0xff]  }
 0x115   : > { %v666_v7 = vor.u32 %v665_v4, %v661_v3  ;;  %v2645_v4 = vld [vmem:[%s3416_s5 + $0x14] ss:$8 sps:$4 sm:$0xff]  }
 0x116   : > { %1032 = vmatpush1.bf16.msra.mxu0 %v2619_v14  ;;  %v2660_v14 = vld [vmem:[%s3416_s5 + $0x64] ss:$8 sps:$4 sm:$0xff]  }
 0x117   : > { %2498 = vmatmul.mubr.msk.bf16.vlgmr.msra.gmra.mrb[8].mxu1 %vm691_vm5, %v666_v7  ;;  %1033 = vmatprep.subr.bf16.mxu0 %v2624_v15  ;;  %v2646_v7 = vld [vmem:[%s3416_s5 + $0x20] ss:$8 sps:$4 sm:$0xff]  }
 0x118   : > { %2514 = vmatpush3.bf16.msra.mxu1 %v2612_v6  ;;  %2521 = vmatprep.mubr.msk.bf16.mxu1 %vm2809_vm4, %v2808_v21  ;;  %v2648_v6 = vld [vmem:[%s3416_s5 + $0x24] ss:$8 sps:$4 sm:$0xff]   ;;  %v2658_v15 = vld [vmem:[%s3416_s5 + $0x60] ss:$8 sps:$4 sm:$0xff]  }
 0x119   : > { %2515 = vmatprep.subr.bf16.mxu1 %v2808_v21 }
 0x11a   : > { %1034 = vmatpush1.bf16.msra.mxu0 %v2622_v16  ;;  %v2663_v16 = vld [vmem:[%s3416_s5 + $0x74] ss:$8 sps:$4 sm:$0xff]  }
 0x11b   : > { %1035 = vmatprep.subr.bf16.mxu0 %v2627_v17  ;;  %v2661_v17 = vld [vmem:[%s3416_s5 + $0x70] ss:$8 sps:$4 sm:$0xff]  }
 0x11c   : > { %2516 = vmatpush3.bf16.msra.mxu1 %v2613_v8  ;;  %v2651_v8 = vld [vmem:[%s3416_s5 + $0x34] ss:$8 sps:$4 sm:$0xff]  }
 0x11d   : > { %2517 = vmatprep.subr.bf16.mxu1 %v2808_v21 }
 0x11e   : > { %1036 = vmatpush1.bf16.msra.mxu0 %v2625_v18  ;;  %v2666_v18 = vld [vmem:[%s3416_s5 + $0x104] ss:$8 sps:$4 sm:$0xff]  }
 0x11f   : > { %1037 = vmatprep.subr.bf16.mxu0 %v2630_v19  ;;  %v2664_v19 = vld [vmem:[%s3416_s5 + $0x100] ss:$8 sps:$4 sm:$0xff]  }
 0x120   : > { %2518 = vmatpush3.bf16.msra.mxu1 %v2614_v9  ;;  %v2649_v9 = vld [vmem:[%s3416_s5 + $0x30] ss:$8 sps:$4 sm:$0xff]  }
 0x121   : > { %2519 = vmatprep.subr.bf16.mxu1 %v2808_v21 }
 0x122   : > { %1038 = vmatpush1.bf16.msra.mxu0 %v2628_v20  ;;  %v2669_v20 = vld [vmem:[%s3416_s5 + $0x114] ss:$8 sps:$4 sm:$0xff]  }
 0x123   : > { %1039 = vmatprep.subr.bf16.mxu0 %v2633_v22  ;;  %v2667_v22 = vld [vmem:[%s3416_s5 + $0x110] ss:$8 sps:$4 sm:$0xff]  }
 0x124   : > { %2520 = vmatpush3.bf16.msra.mxu1 %v2615_v10  ;;  %v2654_v10 = vld [vmem:[%s3416_s5 + $0x44] ss:$8 sps:$4 sm:$0xff]  }
 0x125   : > { %2396 = vmatprep.subr.bf16.mxu1 %v2688_v30  ;;  %v2679_v30 = vld [vmem:[%s3416_s5 + $0x150] ss:$8 sps:$4 sm:$0xff]  }
 0x126   : > { %1040 = vmatpush1.bf16.msra.mxu0 %v2631_v23  ;;  %v2672_v23 = vld [vmem:[%s3416_s5 + $0x124] ss:$8 sps:$4 sm:$0xff]  }
 0x127   : > { %2522 = vmatmul.mubr.msk.bf16.vlgmr.msra.gmra.mrb[12].mxu1 %vm691_vm5, %v816_v5  ;;  %1041 = vmatprep.subr.bf16.mxu0 %v2636_v24  ;;  %v2643_v5 = vld [vmem:[%s3416_s5 + $0x10] ss:$8 sps:$4 sm:$0xff]   ;;  %v2670_v24 = vld [vmem:[%s3416_s5 + $0x120] ss:$8 sps:$4 sm:$0xff]  }
 0x128   : > { %2397 = vmatpush3.bf16.msra.mxu1 %v2689_v31  ;;  %v2684_v31 = vld [vmem:[%s3416_s5 + $0x164] ss:$8 sps:$4 sm:$0xff]  }
 0x129   : > { %2398 = vmatprep.subr.bf16.mxu1 %v2690_v32  ;;  %v2682_v32 = vld [vmem:[%s3416_s5 + $0x160] ss:$8 sps:$4 sm:$0xff]  }
 0x12a   : > { %1042 = vmatpush1.bf16.msra.mxu0 %v2634_v25  ;;  %v2675_v25 = vld [vmem:[%s3416_s5 + $0x134] ss:$8 sps:$4 sm:$0xff]  }
 0x12b   : > { %1043 = vmatprep.subr.bf16.mxu0 %v2639_v27  ;;  %v2678_v27 = vld [vmem:[%s3416_s5 + $0x144] ss:$8 sps:$4 sm:$0xff]  }
 0x12c   : > { %2399 = vmatpush3.bf16.msra.mxu1 %v2691_v33  ;;  %v2687_v33 = vld [vmem:[%s3416_s5 + $0x174] ss:$8 sps:$4 sm:$0xff]  }
 0x12d   : > { %2400 = vmatprep.subr.bf16.mxu1 %v2692_v34  ;;  %v2685_v34 = vld [vmem:[%s3416_s5 + $0x170] ss:$8 sps:$4 sm:$0xff]  }
 0x12e   : > { %1044 = vmatpush1.bf16.msra.mxu0 %v2637_v26  ;;  %v2673_v26 = vld [vmem:[%s3416_s5 + $0x130] ss:$8 sps:$4 sm:$0xff]  }
 0x12f   : > { %1152 = vmatprep.subr.bf16.mxu0 %v2642_v29  ;;  %v2681_v29 = vld [vmem:[%s3416_s5 + $0x154] ss:$8 sps:$4 sm:$0xff]  }
 0x130   : > { %2401 = vmatpush3.bf16.msra.mxu1 %v2693_v35 }
 0x1e4   : > { %v796_v36 = vpop.f32.mrb[4].mxu0 }
 0x1e5   : > { %v2511_v37 = vpop.f32.mrb[5].mxu0 }
 0x1e6   : > { %v799_v38 = vpop.f32.mrb[6].mxu0  ;;  %v2695_v37 = vld [vmem:[%s3418_s7 + $0x98] sm:$0xff]  }
 0x1e7   : > { %v2512_v39 = vpop.f32.mrb[7].mxu0 }
 0x1e8   : > { %v2697_v39 = vld [vmem:[%s3418_s7 + $0xa0] sm:$0xff]  }
 0x1ea   : > { %v729_v40 = vpop.f32.mrb[8].mxu1 }
 0x1eb   : > { %v797_v41 = vadd.f32 %v796_v36, %v729_v40  ;;  %v2499_v42 = vpop.f32.mrb[9].mxu1  ;;  %v2694_v36 = vld [vmem:[%s3418_s7 + $0xd8] sm:$0xff]   ;;  %v2698_v40 = vld [vmem:[%s3418_s7 + $0xe8] sm:$0xff]  }
 0x1ec   : > { %v732_v43 = vpop.f32.mrb[10].mxu1  ;;  %2402 = vmatprep.subr.bf16.mxu1 %v2694_v36  ;;  %v2700_v42 = vld [vmem:[%s3418_s7 + $0xf0] sm:$0xff]   ;;  %v2718_v36 = vld [vmem:[%s3418_s7 + $0x78] sm:$0xff]  }
 0x1ed   : > { %v800_v44 = vadd.f32 %v799_v38, %v732_v43  ;;  %v2500_v45 = vpop.f32.mrb[11].mxu1  ;;  %2403 = vmatpush3.bf16.msra.mxu1 %v2695_v37  ;;  %v2696_v38 = vld [vmem:[%s3418_s7 + $0xe0] sm:$0xff]   ;;  %v2701_v43 = vld [vmem:[%s3418_s7 + $0xb0] sm:$0xff]   ;;  %v2719_v37 = vld [vmem:[%s3418_s7 + $0x38] sm:$0xff]  }
 0x1ee   : > { %2404 = vmatprep.subr.bf16.mxu1 %v2696_v38  ;;  %v2703_v45 = vld [vmem:[%s3418_s7 + $0xb8] sm:$0xff]   ;;  %v2720_v38 = vld [vmem:[%s3418_s7 + $0x140] sm:$0xff]  }
 0x1f1   : > { %2405 = vmatpush3.bf16.msra.mxu1 %v2697_v39  ;;  %v2721_v39 = vld [vmem:[%s3418_s7 + $0x100] sm:$0xff]  }
 0x1f2   : > { %2406 = vmatprep.subr.bf16.mxu1 %v2698_v40  ;;  %v2722_v40 = vld [vmem:[%s3418_s7 + $0x148] sm:$0xff]  }
 0x1fa   : > { %v878_v46 = vpop.f32.mrb[12].mxu1 }
 0x1fb   : > { %v885_v48 = vadd.f32 %v878_v46, %v797_v41  ;;  %v2523_v49 = vpop.f32.mrb[13].mxu1  ;;  %v2699_v41 = vld [vmem:[%s3418_s7 + $0xa8] sm:$0xff]   ;;  %v2704_v46 = vld [vmem:[%s3418_s7 + $0x40] sm:$0xff]  }
 0x1fc   : > { %v881_v50 = vpop.f32.mrb[14].mxu1  ;;  %2407 = vmatpush3.bf16.msra.mxu1 %v2699_v41 }
 0x1fd   : > { %v894_v51 = vadd.f32 %v2167_v47, %v885_v48  ;;  %v886_v52 = vadd.f32 %v881_v50, %v800_v44  ;;  %v2524_v53 = vpop.f32.mrb[15].mxu1  ;;  %2408 = vmatprep.subr.bf16.mxu1 %v2700_v42  ;;  %v2702_v44 = vld [vmem:[%s3418_s7 + $0xf8] sm:$0xff]   ;;  %v1342_v50 = vld [vmem:[%s3417_s6] sm:$0x3]  ;;  %v2723_v42 = vld [vmem:[%s3418_s7 + $0x108] sm:$0xff]  }
 0x1ff   : > { %v896_v54 = vmax.f32 %v894_v51, 0.0  ;;  %v895_v55 = vadd.f32 %v2167_v47, %v886_v52  ;;  %v1344_v47 = vlaneseq }
 0x200   : > { %2409 = vmatpush3.bf16.msra.mxu1 %v2701_v43  ;;  %v2724_v43 = vld [vmem:[%s3418_s7 + $0x150] sm:$0xff]  }
 0x201   : > { %v897_v56 = vmax.f32 %v895_v55, 0.0  ;;  %v900_v57 = vrot.slane %v896_v54, 1  ;;  %2410 = vmatprep.subr.bf16.mxu1 %v2702_v44  ;;  %v1345_v48 = vshrl.u32 %v1344_v47, 7  ;;  %v2725_v44 = vld [vmem:[%s3418_s7 + $0x110] sm:$0xff]   ;;  %v2728_v47 = vld [vmem:[%s3418_s7 + $0x160] sm:$0xff]  }
 0x203   : > { %v901_v58 = vrot.slane %v897_v56, 1  ;;  %v1346_v49 = vsub.s32 0, %v1345_v48  ;;  %v1350_v51 = vsub.s32 1, %v1345_v48  ;;  %v2729_v48 = vld [vmem:[%s3418_s7 + $0x120] sm:$0xff]  }
 0x204   : > { %2411 = vmatpush3.bf16.msra.mxu1 %v2703_v45  ;;  %v2726_v45 = vld [vmem:[%s3418_s7 + $0x158] sm:$0xff]  }
 0x205   : > { %v902_v59 = vsel %vm544_vm1, %v900_v57, %v901_v58  ;;  %v906_v60 = vmax.f32 %v897_v56, %v901_v58  ;;  %2418 = vmatprep.subr.bf16.mxu1 %v2704_v46  ;;  %v1347_v52 = vrot.slane %v1342_v50, %v1346_v49  ;;  %v1351_v53 = vrot.slane %v1342_v50, %v1350_v51  ;;  %v2727_v46 = vld [vmem:[%s3418_s7 + $0x118] sm:$0xff]   ;;  %v2730_v49 = vld [vmem:[%s3418_s7 + $0x168] sm:$0xff]   ;;  %v2732_v51 = vld [vmem:[%s3418_s7 + $0x170] sm:$0xff]  }
 0x206   : > { %v905_v61 = vmax.f32 %v896_v54, %v902_v59  ;;  %v2731_v50 = vld [vmem:[%s3418_s7 + $0x128] sm:$0xff]  }
 0x208   : > { %v3085_v62 = vpack.c.bf16 %v906_v60, %v905_v61 }
 0x20a   : > { %v944_v63 = vshll.u32 %v3085_v62, 16  ;;  %v942_v0 = vshrl.u32 %v3085_v62, 16  ;;  %v1213_v35 = vrot.slane %v3085_v62, 1 }
 0x20c   : > { %v946_v1 = vrot.slane %v944_v63, 1 }
 0x20e   : > { %v947_v3 = vor.u32 %v946_v1, %v942_v0 }
 0x210   : > { %1062 = vmatmul.mubr.bf16.vlgmr.msra.gmra.mrb[8].mxu0 %v947_v3 }
 0x211   : > { %1153 = vmatpush1.bf16.msra.mxu0 %v2640_v2  ;;  %1184 = vmatprep.mubr.bf16.mxu0 %v2810_v28 }
 0x212   : > { %1154 = vmatprep.subr.bf16.mxu0 %v2645_v4 }
 0x215   : > { %1155 = vmatpush1.bf16.msra.mxu0 %v2643_v5 }
 0x216   : > { %1156 = vmatprep.subr.bf16.mxu0 %v2648_v6 }
 0x219   : > { %1157 = vmatpush1.bf16.msra.mxu0 %v2646_v7 }
 0x21a   : > { %1158 = vmatprep.subr.bf16.mxu0 %v2651_v8 }
 0x21d   : > { %1159 = vmatpush1.bf16.msra.mxu0 %v2649_v9 }
 0x21e   : > { %1160 = vmatprep.subr.bf16.mxu0 %v2654_v10 }
 0x221   : > { %1161 = vmatpush1.bf16.msra.mxu0 %v2652_v11 }
 0x222   : > { %1162 = vmatprep.subr.bf16.mxu0 %v2657_v12 }
 0x225   : > { %1163 = vmatpush1.bf16.msra.mxu0 %v2655_v13 }
 0x226   : > { %1164 = vmatprep.subr.bf16.mxu0 %v2660_v14 }
 0x229   : > { %1165 = vmatpush1.bf16.msra.mxu0 %v2658_v15 }
 0x22a   : > { %1166 = vmatprep.subr.bf16.mxu0 %v2663_v16 }
 0x22d   : > { %1167 = vmatpush1.bf16.msra.mxu0 %v2661_v17 }
 0x22e   : > { %1295 = vmatprep.subr.bf16.mxu0 %v2666_v18 }
 0x230   : > { %1185 = vmatmul.mubr.bf16.vlgmr.msra.gmra.mrb[8].mxu0 %v3085_v62 }
 0x231   : > { %1296 = vmatpush1.bf16.msra.mxu0 %v2664_v19  ;;  %1327 = vmatprep.mubr.bf16.mxu0 %v2810_v28  ;;  %v2676_v28 = vld [vmem:[%s3416_s5 + $0x140] ss:$8 sps:$4 sm:$0xff]  }
 0x232   : > { %1297 = vmatprep.subr.bf16.mxu0 %v2669_v20 }
 0x235   : > { %1298 = vmatpush1.bf16.msra.mxu0 %v2667_v22  ;;  %v2705_v22 = vld [vmem:[%s3418_s7] sm:$0xff]  }
 0x236   : > { %1299 = vmatprep.subr.bf16.mxu0 %v2672_v23 }
 0x239   : > { %1300 = vmatpush1.bf16.msra.mxu0 %v2670_v24  ;;  %v2706_v24 = vld [vmem:[%s3418_s7 + $0x48] sm:$0xff]  }
 0x23a   : > { %1301 = vmatprep.subr.bf16.mxu0 %v2675_v25  ;;  %v2707_v25 = vld [vmem:[%s3418_s7 + $0x8] sm:$0xff]  }
 0x23d   : > { %1302 = vmatpush1.bf16.msra.mxu0 %v2673_v26  ;;  %v2708_v26 = vld [vmem:[%s3418_s7 + $0x50] sm:$0xff]  }
 0x23e   : > { %1303 = vmatprep.subr.bf16.mxu0 %v2678_v27  ;;  %v2709_v27 = vld [vmem:[%s3418_s7 + $0x10] sm:$0xff]  }
 0x241   : > { %1304 = vmatpush1.bf16.msra.mxu0 %v2676_v28  ;;  %v2710_v28 = vld [vmem:[%s3418_s7 + $0x58] sm:$0xff]  }
 0x242   : > { %1305 = vmatprep.subr.bf16.mxu0 %v2681_v29  ;;  %v2711_v29 = vld [vmem:[%s3418_s7 + $0x18] sm:$0xff]  }
 0x245   : > { %1306 = vmatpush1.bf16.msra.mxu0 %v2679_v30  ;;  %v2712_v30 = vld [vmem:[%s3418_s7 + $0x60] sm:$0xff]  }
 0x246   : > { %1307 = vmatprep.subr.bf16.mxu0 %v2684_v31  ;;  %v2713_v31 = vld [vmem:[%s3418_s7 + $0x20] sm:$0xff]  }
 0x249   : > { %1308 = vmatpush1.bf16.msra.mxu0 %v2682_v32  ;;  %v2714_v32 = vld [vmem:[%s3418_s7 + $0x68] sm:$0xff]  }
 0x24a   : > { %1309 = vmatprep.subr.bf16.mxu0 %v2687_v33  ;;  %v2715_v33 = vld [vmem:[%s3418_s7 + $0x28] sm:$0xff]  }
 0x24d   : > { %1310 = vmatpush1.bf16.msra.mxu0 %v2685_v34  ;;  %v2716_v34 = vld [vmem:[%s3418_s7 + $0x70] sm:$0xff]  }
 0x24e   : > { %2525 = vmatprep.subr.bf16.mxu0 %v2808_v21 }
 0x250   : > { %1328 = vmatmul.mubr.bf16.vlgmr.msra.gmra.mrb[8].mxu0 %v1213_v35  ;;  %v2717_v35 = vld [vmem:[%s3418_s7 + $0x30] sm:$0xff]  }
 0x251   : > { %2541 = vmatprep.mubr.msk.bf16.mxu0 %vm2809_vm4, %v2808_v21 }
 0x323   : > { %v1329_v54 = vpop.f32.mrb[8].mxu0 }
 0x324   : > { %v1354_v55 = vadd.f32 %v1347_v52, %v1329_v54  ;;  %v1331_v56 = vpop.f32.mrb[9].mxu0  ;;  %v2735_v54 = vld [vmem:[%s3418_s7 + $0x138] sm:$0xff]  }
 0x325   : > { %v1355_v57 = vadd.f32 %v1351_v53, %v1331_v56  ;;  %v1333_v58 = vpop.f32.mrb[10].mxu0  ;;  %v2736_v56 = vld [vmem:[%s3420_s9] sm:$0xff]  }
 0x326   : > { %v1358_v59 = vmax.f32 %v1354_v55, 0.0  ;;  %v1356_v60 = vadd.f32 %v1347_v52, %v1333_v58  ;;  %v1335_v61 = vpop.f32.mrb[11].mxu0  ;;  %v2733_v52 = vld [vmem:[%s3418_s7 + $0x130] sm:$0xff]   ;;  %2526 = vmatpush3.bf16.msra.mxu0 %v2736_v56 }
 0x327   : > { %v1359_v62 = vmax.f32 %v1355_v57, 0.0  ;;  %v1357_v63 = vadd.f32 %v1351_v53, %v1335_v61  ;;  %v2734_v53 = vld [vmem:[%s3418_s7 + $0x178] sm:$0xff]   ;;  %2527 = vmatprep.subr.bf16.mxu0 %v2808_v21  ;;  %v2737_v57 = vld [vmem:[%s3420_s9 + $0x8] sm:$0xff]   ;;  %v2738_v58 = vld [vmem:[%s3420_s9 + $0x10] sm:$0xff]  }
 0x328   : > { %v1360_v0 = vmax.f32 %v1356_v60, 0.0  ;;  %v1366_v2 = vrot.slane %v1358_v59, 1  ;;  %v2740_v60 = vld [vmem:[%s3420_s9 + $0x20] sm:$0xff]   ;;  %v2741_v61 = vld [vmem:[%s3420_s9 + $0x28] sm:$0xff]  }
 0x329   : > { %v1361_v1 = vmax.f32 %v1357_v63, 0.0  ;;  %v1369_v4 = vrot.slane %v1359_v62, 1  ;;  %v2743_v63 = vld [vmem:[%s3420_s9 + $0x38] sm:$0xff]  }
 0x32a   : > { %v1367_v3 = vrot.slane %v1360_v0, 1  ;;  %2528 = vmatpush3.bf16.msra.mxu0 %v2737_v57 }
 0x32b   : > { %v1370_v5 = vrot.slane %v1361_v1, 1  ;;  %2529 = vmatprep.subr.bf16.mxu0 %v2808_v21 }
 0x32c   : > { %v1368_v6 = vsel %vm544_vm1, %v1366_v2, %v1367_v3  ;;  %v1378_v7 = vmax.f32 %v1360_v0, %v1367_v3 }
 0x32d   : > { %v1376_v8 = vmax.f32 %v1358_v59, %v1368_v6  ;;  %v1371_v9 = vsel %vm544_vm1, %v1369_v4, %v1370_v5  ;;  %v1379_v10 = vmax.f32 %v1361_v1, %v1370_v5  ;;  %v2739_v59 = vld [vmem:[%s3420_s9 + $0x18] sm:$0xff]  }
 0x32e   : > { %v1377_v11 = vmax.f32 %v1359_v62, %v1371_v9  ;;  %2530 = vmatpush3.bf16.msra.mxu0 %v2738_v58  ;;  %v2742_v62 = vld [vmem:[%s3420_s9 + $0x30] sm:$0xff]  }
 0x32f   : > { %v3227_v12 = vpack.c.bf16 %v1378_v7, %v1376_v8  ;;  %2531 = vmatprep.subr.bf16.mxu0 %v2808_v21 }
 0x330   : > { %v1381_v13 = vpack.c.bf16 %v1379_v10, %v1377_v11 }
 0x331   : > { %v1450_v14 = vshll.u32 %v3227_v12, 16  ;;  %v1448_v19 = vshrl.u32 %v3227_v12, 16  ;;  %v1772_v55 = vrot.slane %v3227_v12, 1 }
 0x332   : > { %v1457_v15 = vshll.u32 %v1381_v13, 16  ;;  %v1455_v17 = vshrl.u32 %v1381_v13, 16  ;;  %v1773_v41 = vrot.slane %v1381_v13, 1  ;;  %2532 = vmatpush3.bf16.msra.mxu0 %v2739_v59 }
 0x333   : > { %v1452_v16 = vrot.slane %v1450_v14, 1  ;;  %2533 = vmatprep.subr.bf16.mxu0 %v2808_v21 }
 0x334   : > { %v1459_v18 = vrot.slane %v1457_v15, 1 }
 0x335   : > { %v1453_v23 = vor.u32 %v1452_v16, %v1448_v19 }
 0x336   : > { %v1460_v20 = vor.u32 %v1459_v18, %v1455_v17  ;;  %2534 = vmatpush3.bf16.msra.mxu0 %v2740_v60 }
 0x337   : > { %2535 = vmatprep.subr.bf16.mxu0 %v2808_v21 }
 0x338   : > { %1591 = vmatprep.mubr.bf16.mxu1 %v1460_v20 }
 0x339   : > { %1592 = vmatmul.mubr.bf16.vlgmr.msra.gmra.mrb[16].mxu1 %v1453_v23 }
 0x33a   : > { %2419 = vmatpush3.bf16.msra.mxu1 %v2705_v22  ;;  %1728 = vmatprep.mubr.bf16.mxu1 %v1381_v13 }
 0x33b   : > { %2420 = vmatprep.subr.bf16.mxu1 %v2706_v24  ;;  %2536 = vmatpush3.bf16.msra.mxu0 %v2741_v61 }
 0x33c   : > { %2537 = vmatprep.subr.bf16.mxu0 %v2808_v21 }
 0x33e   : > { %2421 = vmatpush3.bf16.msra.mxu1 %v2707_v25 }
 0x33f   : > { %2422 = vmatprep.subr.bf16.mxu1 %v2708_v26  ;;  %2538 = vmatpush3.bf16.msra.mxu0 %v2742_v62 }
 0x340   : > { %2539 = vmatprep.subr.bf16.mxu0 %v2808_v21  ;;  %v2360_v21 = vld [vmem:[%s3419_s8] ss:$0 sm:$0xff] }
 0x342   : > { %2423 = vmatpush3.bf16.msra.mxu1 %v2709_v27 }
 0x343   : > { %2424 = vmatprep.subr.bf16.mxu1 %v2710_v28  ;;  %2540 = vmatpush3.bf16.msra.mxu0 %v2743_v63 }
 0x346   : > { %2425 = vmatpush3.bf16.msra.mxu1 %v2711_v29 }
 0x347   : > { %2426 = vmatprep.subr.bf16.mxu1 %v2712_v30 }
 0x34a   : > { %2427 = vmatpush3.bf16.msra.mxu1 %v2713_v31 }
 0x34b   : > { %2428 = vmatprep.subr.bf16.mxu1 %v2714_v32 }
 0x34e   : > { %2429 = vmatpush3.bf16.msra.mxu1 %v2715_v33 }
 0x34f   : > { %2430 = vmatprep.subr.bf16.mxu1 %v2716_v34 }
 0x352   : > { %2431 = vmatpush3.bf16.msra.mxu1 %v2717_v35 }
 0x353   : > { %2432 = vmatprep.subr.bf16.mxu1 %v2718_v36 }
 0x356   : > { %2433 = vmatpush3.bf16.msra.mxu1 %v2719_v37 }
 0x357   : > { %2440 = vmatprep.subr.bf16.mxu1 %v2720_v38  ;;  %v1956_v38 = vld [vmem:[%s3421_s10] sm:$0x1] }
 0x359   : > { %1729 = vmatmul.mubr.bf16.vlgmr.msra.gmra.mrb[20].mxu1 %v3227_v12 }
 0x35a   : > { %2441 = vmatpush3.bf16.msra.mxu1 %v2721_v39  ;;  %1904 = vmatprep.mubr.bf16.mxu1 %v1773_v41 }
 0x35b   : > { %2442 = vmatprep.subr.bf16.mxu1 %v2722_v40 }
 0x35e   : > { %2443 = vmatpush3.bf16.msra.mxu1 %v2723_v42 }
 0x35f   : > { %2444 = vmatprep.subr.bf16.mxu1 %v2724_v43 }
 0x362   : > { %2445 = vmatpush3.bf16.msra.mxu1 %v2725_v44 }
 0x363   : > { %2446 = vmatprep.subr.bf16.mxu1 %v2726_v45 }
 0x366   : > { %2447 = vmatpush3.bf16.msra.mxu1 %v2727_v46 }
 0x367   : > { %2448 = vmatprep.subr.bf16.mxu1 %v2728_v47 }
 0x36a   : > { %2449 = vmatpush3.bf16.msra.mxu1 %v2729_v48 }
 0x36b   : > { %2450 = vmatprep.subr.bf16.mxu1 %v2730_v49 }
 0x36e   : > { %2451 = vmatpush3.bf16.msra.mxu1 %v2731_v50 }
 0x36f   : > { %2452 = vmatprep.subr.bf16.mxu1 %v2732_v51 }
 0x372   : > { %2453 = vmatpush3.bf16.msra.mxu1 %v2733_v52 }
 0x373   : > { %2454 = vmatprep.subr.bf16.mxu1 %v2734_v53 }
 0x376   : > { %2455 = vmatpush3.bf16.msra.mxu1 %v2735_v54 }
 0x379   : > { %1905 = vmatmul.mubr.bf16.vlgmr.msra.gmra.mrb[24].mxu1 %v1772_v55 }
 0x40c   : > { %v2412_v0 = vpop.f32.mrb[16].mxu1 }
 0x40d   : > { %v2413_v1 = vpop.f32.mrb[17].mxu1 }
 0x40e   : > { %v2414_v2 = vadd.f32 %v2413_v1, %v2412_v0  ;;  %v2415_v3 = vpop.f32.mrb[18].mxu1 }
 0x40f   : > { %v2416_v4 = vpop.f32.mrb[19].mxu1 }
 0x410   : > { %v2417_v5 = vadd.f32 %v2416_v4, %v2415_v3 }
 0x42c   : > { %v2434_v6 = vpop.f32.mrb[20].mxu1 }
 0x42d   : > { %v2435_v7 = vpop.f32.mrb[21].mxu1 }
 0x42e   : > { %v2436_v8 = vadd.f32 %v2435_v7, %v2434_v6  ;;  %v2437_v9 = vpop.f32.mrb[22].mxu1 }
 0x42f   : > { %v2438_v10 = vpop.f32.mrb[23].mxu1 }
 0x430   : > { %v1731_v11 = vadd.f32 %v2436_v8, %v2414_v2  ;;  %v2439_v12 = vadd.f32 %v2438_v10, %v2437_v9 }
 0x432   : > { %v1734_v13 = vadd.f32 %v2439_v12, %v2417_v5 }
 0x44c   : > { %v2456_v14 = vpop.f32.mrb[24].mxu1 }
 0x44d   : > { %v2457_v15 = vpop.f32.mrb[25].mxu1 }
 0x44e   : > { %v2458_v16 = vadd.f32 %v2457_v15, %v2456_v14  ;;  %v2459_v17 = vpop.f32.mrb[26].mxu1 }
 0x44f   : > { %v2460_v18 = vpop.f32.mrb[27].mxu1 }
 0x450   : > { %v1913_v19 = vadd.f32 %v2458_v16, %v1731_v11  ;;  %v2461_v20 = vadd.f32 %v2460_v18, %v2459_v17 }
 0x452   : > { %v1922_v22 = vadd.f32 %v2360_v21, %v1913_v19  ;;  %v1914_v23 = vadd.f32 %v2461_v20, %v1734_v13 }
 0x454   : > { %v1924_v24 = vmax.f32 %v1922_v22, 0.0  ;;  %v1923_v25 = vadd.f32 %v2360_v21, %v1914_v23 }
 0x456   : > { %v1925_v26 = vmax.f32 %v1923_v25, 0.0  ;;  %v1928_v27 = vrot.slane %v1924_v24, 1 }
 0x458   : > { %v1929_v28 = vrot.slane %v1925_v26, 1 }
 0x45a   : > { %v1930_v29 = vsel %vm544_vm1, %v1928_v27, %v1929_v28 }
 0x45b   : > { %v1932_v30 = vmax.f32 %v1924_v24, %v1930_v29 }
 0x45d   : > { %v1933_v31 = vrot.slane %v1932_v30, 4 }
 0x45f   : > { %v1934_v32 = vadd.f32 %v1933_v31, %v1932_v30 }
 0x461   : > { %v1935_v33 = vrot.slane %v1934_v32, 2 }
 0x463   : > { %v1936_v34 = vadd.f32 %v1935_v33, %v1934_v32 }
 0x465   : > { %v1937_v35 = vrot.slane %v1936_v34, 1 }
 0x467   : > { %v1938_v36 = vadd.f32 %v1937_v35, %v1936_v34 }
 0x469   : > { %v1939_v37 = vpack.c.bf16 %v1938_v36, %v1938_v36 }
 0x46b   : > { %2542 = vmatmul.mubr.bf16.vlgmr.msra.gmra.mrb[12].mxu0 %v1939_v37 }
 0x53e   : > { %v2039_v39 = vpop.f32.mrb[12].mxu0 }
 0x53f   : > { %v2040_v40 = vadd.f32 %v2039_v39, %v1956_v38  ;;  %v2543_v41 = vpop.f32.mrb[13].mxu0 }
 0x540   : > { %v2042_v42 = vpop.f32.mrb[14].mxu0 }
 0x541   : > { %v2544_v43 = vpop.f32.mrb[15].mxu0  ;;  %2046 = vst.msk [vmem:[%s378_s15] sm:$0x1] %vm2045_vm6, %v2040_v40 }
 0x542   : > { %2757 = shalt.err (!%p2754_p3)
}
 0x543   : > { %s2758_s30 = scalar_lea.hbm %s3369_s25, 16  ;;  %s2762_s24 = scalar_lea.hbm %s3422_s11, 32 }
 0x544   : > { %p2759_p4 = scmp.ne.s32.totalorder %s3369_s25, %s2758_s30  ;;  %p2763_p9 = scmp.lt.u32.totalorder %s3369_s25, %s3422_s11 }
 0x545   : > { %p2764_p10 = scmp.lt.u32.totalorder %s2762_s24, %s2758_s30  ;;  %p2766_p12 = scmp.lt.u32.totalorder %s2758_s30, %s3369_s25 }
 0x546   : > { %p2760_p7 = pnand %p2759_p4, %p2910_p5 }
 0x547   : > { %p2765_p11 = por %p2764_p10, %p2763_p9 }
 0x548   : > { %p2761_p8 = pneg %p2760_p7 }
 0x549   : > { %p2767_p13 = por %p2766_p12, %p2765_p11 }
 0x54b   : > { %p2768_p0 = pnand %p2767_p13, %p2761_p8 }
 0x54d   : > { %2771 = shalt.err (!%p2768_p0)
}
 0x54e   : > { %2557 = dma.vmem_to_hbm [thread:$0]  (%p2910_p5), %s3371_s16, 16, %s3369_s25, %s2048_s21  }
 0x54f PF: > { %p2563_p1 = scmp.ge.s32.totalorder %s2806_s20, 2  ;;  %s2072_s29 = sand.u32 1, %s2794_s17  }
 0x550   : > { %s2073_s22 = scalar_lea.sflag [#allocation3], %s2072_s29 }
 0x551   : > { %p2560_p2 = pnand %p2563_p1, %p2914_p6 }
 0x553   : > { %2789 = dma.done.wait (!%p2560_p2), %s2073_s22, 16  }
 0x554   : > { %2791 = vsyncadd (!%p2560_p2), %s2073_s22, 4294967280  ;;  %p21_p3 = scmp.ge.s32.totalorder %s2897_s23, 4   ;;  %s3425_s17 = smov %s2798_s18 }
 0x555   : > { %s3426_s18 = smov %s2802_s19  ;;  %s3427_s19 = smov %s2908_s26 }
 0x556   : > { %s3428_s20 = smov %s2897_s23  ;;  %23 = sbr.rel (!%p21_p3) target bundleno = 3 (0x3), region = 107 }
 0x55d   :  { %2077 = vsyncpa [#allocation3], 1 }
 0x55e   :  { %2079 = vsyncpa [#allocation3 + $0x1], 1 }

</bundles_post_ra>
